<compile_context>
chip_gen: v6e
topology: v6e:2x2x1
jax: 0.10.0
libtpu: 0.0.40
codegen_flags: <defaults>
</compile_context>

<pallas_src>
import jax
import jax.numpy as jnp
import numpy as np
from jax import lax
from jax.experimental import pallas as pl
from jax.experimental.pallas import tpu as pltpu


def _regroup_gate_cols(m, H):
    """m: (R, 4H) columns in PyTorch gate order [i, f, g, o] -> order [i, f, o, g]."""
    i_ = m[:, 0 * H:1 * H]
    f_ = m[:, 1 * H:2 * H]
    g_ = m[:, 2 * H:3 * H]
    o_ = m[:, 3 * H:4 * H]
    return jnp.concatenate([i_, f_, o_, g_], axis=1)


def pack_ocean_lstm_params(w_ih, w_hh, b_ih, b_hh, w_fc, b_fc):
    """One-time weight repacking (hoisted out of the per-call path).

    PyTorch convention: w_ih (4H, I), w_hh (4H, H), b_ih/b_hh (4H,), w_fc (O, H), b_fc (O,).
    Returns packed params consumed by ocean_lstm_forward.
    """
    H = w_hh.shape[1]
    f32 = jnp.float32
    bf16 = jnp.bfloat16
    wih_p = _regroup_gate_cols(jnp.transpose(w_ih).astype(f32), H).astype(bf16)   # (I, 4H) bf16
    whh_p = _regroup_gate_cols(jnp.transpose(w_hh).astype(f32), H).astype(bf16)   # (H, 4H) bf16
    b_p = _regroup_gate_cols((b_ih + b_hh).astype(f32).reshape(1, 4 * H), H)      # (1, 4H) f32
    wfc_p = jnp.transpose(w_fc).astype(f32)                                       # (H, O) f32
    bfc_p = b_fc.reshape(1, -1).astype(f32)                                       # (1, O) f32
    return wih_p, whh_p, b_p, wfc_p, bfc_p


def _lstm_fc_kernel(x_ref, wih_ref, b_ref, whh_ref, wfc_ref, bfc_ref, out_ref):
    """x_ref:   (T*B, I) bf16  — time-major rows (row t*B + b is timestep t, batch b)
    wih_ref: (I, 4H) bf16,  b_ref: (1, 4H) f32,  whh_ref: (H, 4H) bf16
    wfc_ref: (H, O) f32,    bfc_ref: (1, O) f32, out_ref: (B, O) f32
    """
    f32 = jnp.float32
    bf16 = jnp.bfloat16
    B = out_ref.shape[0]
    H = whh_ref.shape[0]
    T = x_ref.shape[0] // B

    # Fused input projection for ALL timesteps: one MXU matmul, bf16 in / f32 accumulate.
    wx = jnp.dot(x_ref[...], wih_ref[...], preferred_element_type=f32) + b_ref[...]  # (T*B, 4H)

    whh = whh_ref[...]                       # loop-invariant recurrent weights (bf16)

    h = jnp.zeros((B, H), f32)
    c = jnp.zeros((B, H), f32)

    # T is tiny & static -> fully unrolled; only the recurrent matmul sits on the serial chain.
    # TODO(synk): keep W_hh resident in the MXU across the unrolled steps via
    # pltpu.matmul_push_rhs / matmul_acc_lhs / matmul_pop (generation-specific mxu_index tiling).
    for t in range(T):
        gates = wx[t * B:(t + 1) * B, :] + jnp.dot(
            h.astype(bf16), whh, preferred_element_type=f32)        # (B, 4H) f32
        sig = jax.nn.sigmoid(gates[:, :3 * H])                       # [i | f | o]
        g = jnp.tanh(gates[:, 3 * H:])                               # [g]
        i = sig[:, 0 * H:1 * H]
        f = sig[:, 1 * H:2 * H]
        o = sig[:, 2 * H:3 * H]
        c = f * c + i * g
        h = o * jnp.tanh(c)

    # Final linear layer on last hidden state (h_n[-1] in PyTorch), kept in f32.
    out_ref[...] = (jnp.dot(h, wfc_ref[...], preferred_element_type=f32)
                    + bfc_ref[...]).astype(out_ref.dtype)


@jax.jit
def ocean_lstm_forward(x, wih_p, whh_p, b_p, wfc_p, bfc_p):
    """x: (B, T, input_size) float32; packed params from pack_ocean_lstm_params.

    Returns (B, output_size) float32, matching OceanLSTM.forward(x).
    """
    B, T, I = x.shape
    O = wfc_p.shape[1]
    f32 = jnp.float32

    # Time-major flatten (tiny, fused under jit): row t*B + b holds x[b, t, :].
    x_tm = jnp.transpose(x, (1, 0, 2)).reshape(T * B, I).astype(jnp.bfloat16)

    vmem = pl.BlockSpec(memory_space=pltpu.MemorySpace.VMEM)
    return pl.pallas_call(
        _lstm_fc_kernel,
        out_shape=jax.ShapeDtypeStruct((B, O), f32),
        in_specs=[vmem] * 6,
        out_specs=vmem,
    )(x_tm, wih_p, b_p, whh_p, wfc_p, bfc_p)


def _reference_forward(x, w_ih, w_hh, b_ih, b_hh, w_fc, b_fc):
    """Pure-JAX f32 reference matching torch.nn.LSTM (batch_first) + Linear semantics."""
    B, T, I = x.shape
    H = w_hh.shape[1]
    h = jnp.zeros((B, H), jnp.float32)
    c = jnp.zeros((B, H), jnp.float32)

    def step(carry, x_t):
        h, c = carry
        gates = x_t @ w_ih.T + b_ih + h @ w_hh.T + b_hh
        i = jax.nn.sigmoid(gates[:, 0 * H:1 * H])
        f = jax.nn.sigmoid(gates[:, 1 * H:2 * H])
        g = jnp.tanh(gates[:, 2 * H:3 * H])
        o = jax.nn.sigmoid(gates[:, 3 * H:4 * H])
        c = f * c + i * g
        h = o * jnp.tanh(c)
        return (h, c), None

    (h, _), _ = lax.scan(step, (h, c), jnp.transpose(x, (1, 0, 2)))
    return h @ w_fc.T + b_fc


if __name__ == "__main__":
    # Module defaults: input_size = 17*2 = 34, hidden_size = 64, output_size = 6
    B, T, I, H, O = 2, 8, 34, 64, 6

    key = jax.random.PRNGKey(0)
    ks = jax.random.split(key, 8)
    bound = 1.0 / np.sqrt(H)   # PyTorch LSTM / Linear default init range

    x = jax.random.normal(ks[0], (B, T, I), jnp.float32)
    w_ih = jax.random.uniform(ks[1], (4 * H, I), jnp.float32, -bound, bound)
    w_hh = jax.random.uniform(ks[2], (4 * H, H), jnp.float32, -bound, bound)
    b_ih = jax.random.uniform(ks[3], (4 * H,), jnp.float32, -bound, bound)
    b_hh = jax.random.uniform(ks[4], (4 * H,), jnp.float32, -bound, bound)
    w_fc = jax.random.uniform(ks[5], (O, H), jnp.float32, -bound, bound)
    b_fc = jax.random.uniform(ks[6], (O,), jnp.float32, -bound, bound)

    # One-time packing (out of the steady-state path), then a single jitted pallas_call.
    packed = pack_ocean_lstm_params(w_ih, w_hh, b_ih, b_hh, w_fc, b_fc)
    packed = jax.block_until_ready(packed)

    out = ocean_lstm_forward(x, *packed)
    out = jax.block_until_ready(out)

    ref = _reference_forward(x, w_ih, w_hh, b_ih, b_hh, w_fc, b_fc)
    # Tolerance relaxed vs. the previous all-f32 version because matmul inputs are bf16
    # (f32 MXU accumulation); elementwise/state math remains f32.
    np.testing.assert_allclose(np.asarray(out), np.asarray(ref), rtol=3e-2, atol=3e-2)
    assert out.shape == (B, O) and out.dtype == jnp.float32

    print("KERNEL_OK")
</pallas_src>

<mosaic_0001>
module attributes {stable_mosaic.version = 11 : i64} {
  func.func @_lstm_fc_kernel(%arg0: memref<16x34xbf16, #tpu.memory_space<vmem>>, %arg1: memref<34x256xbf16, #tpu.memory_space<vmem>>, %arg2: memref<1x256xf32, #tpu.memory_space<vmem>>, %arg3: memref<64x256xbf16, #tpu.memory_space<vmem>>, %arg4: memref<64x6xf32, #tpu.memory_space<vmem>>, %arg5: memref<1x6xf32, #tpu.memory_space<vmem>>, %arg6: memref<2x6xf32, #tpu.memory_space<vmem>>) attributes {dimension_semantics = [], scalar_prefetch = 0 : i64, scratch_operands = 0 : i64, tpu.core_type = #tpu.core_type<tc>} {
    %c0 = arith.constant 0 : index
    %c0_0 = arith.constant 0 : index
    %0 = vector.load %arg0[%c0, %c0_0] : memref<16x34xbf16, #tpu.memory_space<vmem>>, vector<16x34xbf16>
    %c0_1 = arith.constant 0 : index
    %c0_2 = arith.constant 0 : index
    %1 = vector.load %arg1[%c0_1, %c0_2] : memref<34x256xbf16, #tpu.memory_space<vmem>>, vector<34x256xbf16>
    %cst = arith.constant dense<0.000000e+00> : vector<16x256xf32>
    %2 = tpu.matmul %0, %1, %cst {dimension_numbers = #tpu.dot_dimension_numbers<[1], [0], [0], [1], [0, 0, 1, 1], [], []>} : vector<16x34xbf16>, vector<34x256xbf16>, vector<16x256xf32> -> vector<16x256xf32>
    %c0_3 = arith.constant 0 : index
    %c0_4 = arith.constant 0 : index
    %3 = vector.load %arg2[%c0_3, %c0_4] : memref<1x256xf32, #tpu.memory_space<vmem>>, vector<1x256xf32>
    %4 = vector.broadcast %3 : vector<1x256xf32> to vector<16x256xf32>
    %5 = arith.addf %2, %4 : vector<16x256xf32>
    %c0_5 = arith.constant 0 : index
    %c0_6 = arith.constant 0 : index
    %6 = vector.load %arg3[%c0_5, %c0_6] : memref<64x256xbf16, #tpu.memory_space<vmem>>, vector<64x256xbf16>
    %cst_7 = arith.constant 0.000000e+00 : f32
    %7 = vector.broadcast %cst_7 : f32 to vector<2x64xf32>
    %cst_8 = arith.constant 0.000000e+00 : f32
    %8 = vector.broadcast %cst_8 : f32 to vector<2x64xf32>
    %9 = vector.extract_strided_slice %5 {offsets = [0, 0], sizes = [2, 256], strides = [1, 1]} : vector<16x256xf32> to vector<2x256xf32>
    %10 = arith.truncf %7 : vector<2x64xf32> to vector<2x64xbf16>
    %cst_9 = arith.constant dense<0.000000e+00> : vector<2x256xf32>
    %11 = tpu.matmul %10, %6, %cst_9 {dimension_numbers = #tpu.dot_dimension_numbers<[1], [0], [0], [1], [0, 0, 1, 1], [], []>} : vector<2x64xbf16>, vector<64x256xbf16>, vector<2x256xf32> -> vector<2x256xf32>
    %12 = arith.addf %9, %11 : vector<2x256xf32>
    %13 = vector.extract_strided_slice %12 {offsets = [0, 0], sizes = [2, 192], strides = [1, 1]} : vector<2x256xf32> to vector<2x192xf32>
    %14 = arith.negf %13 : vector<2x192xf32>
    %15 = math.exp %14 : vector<2x192xf32>
    %cst_10 = arith.constant 1.000000e+00 : f32
    %16 = vector.broadcast %cst_10 : f32 to vector<2x192xf32>
    %17 = arith.addf %16, %15 : vector<2x192xf32>
    %18 = arith.divf %16, %17 : vector<2x192xf32>
    %19 = vector.extract_strided_slice %12 {offsets = [0, 192], sizes = [2, 64], strides = [1, 1]} : vector<2x256xf32> to vector<2x64xf32>
    %20 = math.tanh %19 : vector<2x64xf32>
    %21 = vector.extract_strided_slice %18 {offsets = [0, 0], sizes = [2, 64], strides = [1, 1]} : vector<2x192xf32> to vector<2x64xf32>
    %22 = vector.extract_strided_slice %18 {offsets = [0, 64], sizes = [2, 64], strides = [1, 1]} : vector<2x192xf32> to vector<2x64xf32>
    %23 = vector.extract_strided_slice %18 {offsets = [0, 128], sizes = [2, 64], strides = [1, 1]} : vector<2x192xf32> to vector<2x64xf32>
    %24 = arith.mulf %22, %8 : vector<2x64xf32>
    %25 = arith.mulf %21, %20 : vector<2x64xf32>
    %26 = arith.addf %24, %25 : vector<2x64xf32>
    %27 = math.tanh %26 : vector<2x64xf32>
    %28 = arith.mulf %23, %27 : vector<2x64xf32>
    %29 = vector.extract_strided_slice %5 {offsets = [2, 0], sizes = [2, 256], strides = [1, 1]} : vector<16x256xf32> to vector<2x256xf32>
    %30 = arith.truncf %28 : vector<2x64xf32> to vector<2x64xbf16>
    %cst_11 = arith.constant dense<0.000000e+00> : vector<2x256xf32>
    %31 = tpu.matmul %30, %6, %cst_11 {dimension_numbers = #tpu.dot_dimension_numbers<[1], [0], [0], [1], [0, 0, 1, 1], [], []>} : vector<2x64xbf16>, vector<64x256xbf16>, vector<2x256xf32> -> vector<2x256xf32>
    %32 = arith.addf %29, %31 : vector<2x256xf32>
    %33 = vector.extract_strided_slice %32 {offsets = [0, 0], sizes = [2, 192], strides = [1, 1]} : vector<2x256xf32> to vector<2x192xf32>
    %34 = arith.negf %33 : vector<2x192xf32>
    %35 = math.exp %34 : vector<2x192xf32>
    %cst_12 = arith.constant 1.000000e+00 : f32
    %36 = vector.broadcast %cst_12 : f32 to vector<2x192xf32>
    %37 = arith.addf %36, %35 : vector<2x192xf32>
    %38 = arith.divf %36, %37 : vector<2x192xf32>
    %39 = vector.extract_strided_slice %32 {offsets = [0, 192], sizes = [2, 64], strides = [1, 1]} : vector<2x256xf32> to vector<2x64xf32>
    %40 = math.tanh %39 : vector<2x64xf32>
    %41 = vector.extract_strided_slice %38 {offsets = [0, 0], sizes = [2, 64], strides = [1, 1]} : vector<2x192xf32> to vector<2x64xf32>
    %42 = vector.extract_strided_slice %38 {offsets = [0, 64], sizes = [2, 64], strides = [1, 1]} : vector<2x192xf32> to vector<2x64xf32>
    %43 = vector.extract_strided_slice %38 {offsets = [0, 128], sizes = [2, 64], strides = [1, 1]} : vector<2x192xf32> to vector<2x64xf32>
    %44 = arith.mulf %42, %26 : vector<2x64xf32>
    %45 = arith.mulf %41, %40 : vector<2x64xf32>
    %46 = arith.addf %44, %45 : vector<2x64xf32>
    %47 = math.tanh %46 : vector<2x64xf32>
    %48 = arith.mulf %43, %47 : vector<2x64xf32>
    %49 = vector.extract_strided_slice %5 {offsets = [4, 0], sizes = [2, 256], strides = [1, 1]} : vector<16x256xf32> to vector<2x256xf32>
    %50 = arith.truncf %48 : vector<2x64xf32> to vector<2x64xbf16>
    %cst_13 = arith.constant dense<0.000000e+00> : vector<2x256xf32>
    %51 = tpu.matmul %50, %6, %cst_13 {dimension_numbers = #tpu.dot_dimension_numbers<[1], [0], [0], [1], [0, 0, 1, 1], [], []>} : vector<2x64xbf16>, vector<64x256xbf16>, vector<2x256xf32> -> vector<2x256xf32>
    %52 = arith.addf %49, %51 : vector<2x256xf32>
    %53 = vector.extract_strided_slice %52 {offsets = [0, 0], sizes = [2, 192], strides = [1, 1]} : vector<2x256xf32> to vector<2x192xf32>
    %54 = arith.negf %53 : vector<2x192xf32>
    %55 = math.exp %54 : vector<2x192xf32>
    %cst_14 = arith.constant 1.000000e+00 : f32
    %56 = vector.broadcast %cst_14 : f32 to vector<2x192xf32>
    %57 = arith.addf %56, %55 : vector<2x192xf32>
    %58 = arith.divf %56, %57 : vector<2x192xf32>
    %59 = vector.extract_strided_slice %52 {offsets = [0, 192], sizes = [2, 64], strides = [1, 1]} : vector<2x256xf32> to vector<2x64xf32>
    %60 = math.tanh %59 : vector<2x64xf32>
    %61 = vector.extract_strided_slice %58 {offsets = [0, 0], sizes = [2, 64], strides = [1, 1]} : vector<2x192xf32> to vector<2x64xf32>
    %62 = vector.extract_strided_slice %58 {offsets = [0, 64], sizes = [2, 64], strides = [1, 1]} : vector<2x192xf32> to vector<2x64xf32>
    %63 = vector.extract_strided_slice %58 {offsets = [0, 128], sizes = [2, 64], strides = [1, 1]} : vector<2x192xf32> to vector<2x64xf32>
    %64 = arith.mulf %62, %46 : vector<2x64xf32>
    %65 = arith.mulf %61, %60 : vector<2x64xf32>
    %66 = arith.addf %64, %65 : vector<2x64xf32>
    %67 = math.tanh %66 : vector<2x64xf32>
    %68 = arith.mulf %63, %67 : vector<2x64xf32>
    %69 = vector.extract_strided_slice %5 {offsets = [6, 0], sizes = [2, 256], strides = [1, 1]} : vector<16x256xf32> to vector<2x256xf32>
    %70 = arith.truncf %68 : vector<2x64xf32> to vector<2x64xbf16>
    %cst_15 = arith.constant dense<0.000000e+00> : vector<2x256xf32>
    %71 = tpu.matmul %70, %6, %cst_15 {dimension_numbers = #tpu.dot_dimension_numbers<[1], [0], [0], [1], [0, 0, 1, 1], [], []>} : vector<2x64xbf16>, vector<64x256xbf16>, vector<2x256xf32> -> vector<2x256xf32>
    %72 = arith.addf %69, %71 : vector<2x256xf32>
    %73 = vector.extract_strided_slice %72 {offsets = [0, 0], sizes = [2, 192], strides = [1, 1]} : vector<2x256xf32> to vector<2x192xf32>
    %74 = arith.negf %73 : vector<2x192xf32>
    %75 = math.exp %74 : vector<2x192xf32>
    %cst_16 = arith.constant 1.000000e+00 : f32
    %76 = vector.broadcast %cst_16 : f32 to vector<2x192xf32>
    %77 = arith.addf %76, %75 : vector<2x192xf32>
    %78 = arith.divf %76, %77 : vector<2x192xf32>
    %79 = vector.extract_strided_slice %72 {offsets = [0, 192], sizes = [2, 64], strides = [1, 1]} : vector<2x256xf32> to vector<2x64xf32>
    %80 = math.tanh %79 : vector<2x64xf32>
    %81 = vector.extract_strided_slice %78 {offsets = [0, 0], sizes = [2, 64], strides = [1, 1]} : vector<2x192xf32> to vector<2x64xf32>
    %82 = vector.extract_strided_slice %78 {offsets = [0, 64], sizes = [2, 64], strides = [1, 1]} : vector<2x192xf32> to vector<2x64xf32>
    %83 = vector.extract_strided_slice %78 {offsets = [0, 128], sizes = [2, 64], strides = [1, 1]} : vector<2x192xf32> to vector<2x64xf32>
    %84 = arith.mulf %82, %66 : vector<2x64xf32>
    %85 = arith.mulf %81, %80 : vector<2x64xf32>
    %86 = arith.addf %84, %85 : vector<2x64xf32>
    %87 = math.tanh %86 : vector<2x64xf32>
    %88 = arith.mulf %83, %87 : vector<2x64xf32>
    %89 = vector.extract_strided_slice %5 {offsets = [8, 0], sizes = [2, 256], strides = [1, 1]} : vector<16x256xf32> to vector<2x256xf32>
    %90 = arith.truncf %88 : vector<2x64xf32> to vector<2x64xbf16>
    %cst_17 = arith.constant dense<0.000000e+00> : vector<2x256xf32>
    %91 = tpu.matmul %90, %6, %cst_17 {dimension_numbers = #tpu.dot_dimension_numbers<[1], [0], [0], [1], [0, 0, 1, 1], [], []>} : vector<2x64xbf16>, vector<64x256xbf16>, vector<2x256xf32> -> vector<2x256xf32>
    %92 = arith.addf %89, %91 : vector<2x256xf32>
    %93 = vector.extract_strided_slice %92 {offsets = [0, 0], sizes = [2, 192], strides = [1, 1]} : vector<2x256xf32> to vector<2x192xf32>
    %94 = arith.negf %93 : vector<2x192xf32>
    %95 = math.exp %94 : vector<2x192xf32>
    %cst_18 = arith.constant 1.000000e+00 : f32
    %96 = vector.broadcast %cst_18 : f32 to vector<2x192xf32>
    %97 = arith.addf %96, %95 : vector<2x192xf32>
    %98 = arith.divf %96, %97 : vector<2x192xf32>
    %99 = vector.extract_strided_slice %92 {offsets = [0, 192], sizes = [2, 64], strides = [1, 1]} : vector<2x256xf32> to vector<2x64xf32>
    %100 = math.tanh %99 : vector<2x64xf32>
    %101 = vector.extract_strided_slice %98 {offsets = [0, 0], sizes = [2, 64], strides = [1, 1]} : vector<2x192xf32> to vector<2x64xf32>
    %102 = vector.extract_strided_slice %98 {offsets = [0, 64], sizes = [2, 64], strides = [1, 1]} : vector<2x192xf32> to vector<2x64xf32>
    %103 = vector.extract_strided_slice %98 {offsets = [0, 128], sizes = [2, 64], strides = [1, 1]} : vector<2x192xf32> to vector<2x64xf32>
    %104 = arith.mulf %102, %86 : vector<2x64xf32>
    %105 = arith.mulf %101, %100 : vector<2x64xf32>
    %106 = arith.addf %104, %105 : vector<2x64xf32>
    %107 = math.tanh %106 : vector<2x64xf32>
    %108 = arith.mulf %103, %107 : vector<2x64xf32>
    %109 = vector.extract_strided_slice %5 {offsets = [10, 0], sizes = [2, 256], strides = [1, 1]} : vector<16x256xf32> to vector<2x256xf32>
    %110 = arith.truncf %108 : vector<2x64xf32> to vector<2x64xbf16>
    %cst_19 = arith.constant dense<0.000000e+00> : vector<2x256xf32>
    %111 = tpu.matmul %110, %6, %cst_19 {dimension_numbers = #tpu.dot_dimension_numbers<[1], [0], [0], [1], [0, 0, 1, 1], [], []>} : vector<2x64xbf16>, vector<64x256xbf16>, vector<2x256xf32> -> vector<2x256xf32>
    %112 = arith.addf %109, %111 : vector<2x256xf32>
    %113 = vector.extract_strided_slice %112 {offsets = [0, 0], sizes = [2, 192], strides = [1, 1]} : vector<2x256xf32> to vector<2x192xf32>
    %114 = arith.negf %113 : vector<2x192xf32>
    %115 = math.exp %114 : vector<2x192xf32>
    %cst_20 = arith.constant 1.000000e+00 : f32
    %116 = vector.broadcast %cst_20 : f32 to vector<2x192xf32>
    %117 = arith.addf %116, %115 : vector<2x192xf32>
    %118 = arith.divf %116, %117 : vector<2x192xf32>
    %119 = vector.extract_strided_slice %112 {offsets = [0, 192], sizes = [2, 64], strides = [1, 1]} : vector<2x256xf32> to vector<2x64xf32>
    %120 = math.tanh %119 : vector<2x64xf32>
    %121 = vector.extract_strided_slice %118 {offsets = [0, 0], sizes = [2, 64], strides = [1, 1]} : vector<2x192xf32> to vector<2x64xf32>
    %122 = vector.extract_strided_slice %118 {offsets = [0, 64], sizes = [2, 64], strides = [1, 1]} : vector<2x192xf32> to vector<2x64xf32>
    %123 = vector.extract_strided_slice %118 {offsets = [0, 128], sizes = [2, 64], strides = [1, 1]} : vector<2x192xf32> to vector<2x64xf32>
    %124 = arith.mulf %122, %106 : vector<2x64xf32>
    %125 = arith.mulf %121, %120 : vector<2x64xf32>
    %126 = arith.addf %124, %125 : vector<2x64xf32>
    %127 = math.tanh %126 : vector<2x64xf32>
    %128 = arith.mulf %123, %127 : vector<2x64xf32>
    %129 = vector.extract_strided_slice %5 {offsets = [12, 0], sizes = [2, 256], strides = [1, 1]} : vector<16x256xf32> to vector<2x256xf32>
    %130 = arith.truncf %128 : vector<2x64xf32> to vector<2x64xbf16>
    %cst_21 = arith.constant dense<0.000000e+00> : vector<2x256xf32>
    %131 = tpu.matmul %130, %6, %cst_21 {dimension_numbers = #tpu.dot_dimension_numbers<[1], [0], [0], [1], [0, 0, 1, 1], [], []>} : vector<2x64xbf16>, vector<64x256xbf16>, vector<2x256xf32> -> vector<2x256xf32>
    %132 = arith.addf %129, %131 : vector<2x256xf32>
    %133 = vector.extract_strided_slice %132 {offsets = [0, 0], sizes = [2, 192], strides = [1, 1]} : vector<2x256xf32> to vector<2x192xf32>
    %134 = arith.negf %133 : vector<2x192xf32>
    %135 = math.exp %134 : vector<2x192xf32>
    %cst_22 = arith.constant 1.000000e+00 : f32
    %136 = vector.broadcast %cst_22 : f32 to vector<2x192xf32>
    %137 = arith.addf %136, %135 : vector<2x192xf32>
    %138 = arith.divf %136, %137 : vector<2x192xf32>
    %139 = vector.extract_strided_slice %132 {offsets = [0, 192], sizes = [2, 64], strides = [1, 1]} : vector<2x256xf32> to vector<2x64xf32>
    %140 = math.tanh %139 : vector<2x64xf32>
    %141 = vector.extract_strided_slice %138 {offsets = [0, 0], sizes = [2, 64], strides = [1, 1]} : vector<2x192xf32> to vector<2x64xf32>
    %142 = vector.extract_strided_slice %138 {offsets = [0, 64], sizes = [2, 64], strides = [1, 1]} : vector<2x192xf32> to vector<2x64xf32>
    %143 = vector.extract_strided_slice %138 {offsets = [0, 128], sizes = [2, 64], strides = [1, 1]} : vector<2x192xf32> to vector<2x64xf32>
    %144 = arith.mulf %142, %126 : vector<2x64xf32>
    %145 = arith.mulf %141, %140 : vector<2x64xf32>
    %146 = arith.addf %144, %145 : vector<2x64xf32>
    %147 = math.tanh %146 : vector<2x64xf32>
    %148 = arith.mulf %143, %147 : vector<2x64xf32>
    %149 = vector.extract_strided_slice %5 {offsets = [14, 0], sizes = [2, 256], strides = [1, 1]} : vector<16x256xf32> to vector<2x256xf32>
    %150 = arith.truncf %148 : vector<2x64xf32> to vector<2x64xbf16>
    %cst_23 = arith.constant dense<0.000000e+00> : vector<2x256xf32>
    %151 = tpu.matmul %150, %6, %cst_23 {dimension_numbers = #tpu.dot_dimension_numbers<[1], [0], [0], [1], [0, 0, 1, 1], [], []>} : vector<2x64xbf16>, vector<64x256xbf16>, vector<2x256xf32> -> vector<2x256xf32>
    %152 = arith.addf %149, %151 : vector<2x256xf32>
    %153 = vector.extract_strided_slice %152 {offsets = [0, 0], sizes = [2, 192], strides = [1, 1]} : vector<2x256xf32> to vector<2x192xf32>
    %154 = arith.negf %153 : vector<2x192xf32>
    %155 = math.exp %154 : vector<2x192xf32>
    %cst_24 = arith.constant 1.000000e+00 : f32
    %156 = vector.broadcast %cst_24 : f32 to vector<2x192xf32>
    %157 = arith.addf %156, %155 : vector<2x192xf32>
    %158 = arith.divf %156, %157 : vector<2x192xf32>
    %159 = vector.extract_strided_slice %152 {offsets = [0, 192], sizes = [2, 64], strides = [1, 1]} : vector<2x256xf32> to vector<2x64xf32>
    %160 = math.tanh %159 : vector<2x64xf32>
    %161 = vector.extract_strided_slice %158 {offsets = [0, 0], sizes = [2, 64], strides = [1, 1]} : vector<2x192xf32> to vector<2x64xf32>
    %162 = vector.extract_strided_slice %158 {offsets = [0, 64], sizes = [2, 64], strides = [1, 1]} : vector<2x192xf32> to vector<2x64xf32>
    %163 = vector.extract_strided_slice %158 {offsets = [0, 128], sizes = [2, 64], strides = [1, 1]} : vector<2x192xf32> to vector<2x64xf32>
    %164 = arith.mulf %162, %146 : vector<2x64xf32>
    %165 = arith.mulf %161, %160 : vector<2x64xf32>
    %166 = arith.addf %164, %165 : vector<2x64xf32>
    %167 = math.tanh %166 : vector<2x64xf32>
    %168 = arith.mulf %163, %167 : vector<2x64xf32>
    %c0_25 = arith.constant 0 : index
    %c0_26 = arith.constant 0 : index
    %169 = vector.load %arg4[%c0_25, %c0_26] : memref<64x6xf32, #tpu.memory_space<vmem>>, vector<64x6xf32>
    %cst_27 = arith.constant dense<0.000000e+00> : vector<2x6xf32>
    %170 = tpu.matmul %168, %169, %cst_27 {dimension_numbers = #tpu.dot_dimension_numbers<[1], [0], [0], [1], [0, 0, 1, 1], [], []>} : vector<2x64xf32>, vector<64x6xf32>, vector<2x6xf32> -> vector<2x6xf32>
    %c0_28 = arith.constant 0 : index
    %c0_29 = arith.constant 0 : index
    %171 = vector.load %arg5[%c0_28, %c0_29] : memref<1x6xf32, #tpu.memory_space<vmem>>, vector<1x6xf32>
    %172 = vector.broadcast %171 : vector<1x6xf32> to vector<2x6xf32>
    %173 = arith.addf %170, %172 : vector<2x6xf32>
    %c0_30 = arith.constant 0 : index
    %c0_31 = arith.constant 0 : index
    %174 = vector.load %arg6[%c0_30, %c0_31] : memref<2x6xf32, #tpu.memory_space<vmem>>, vector<2x6xf32>
    tpu.vector_store %arg6[%c0_30, %c0_31], %173 {strides = array<i32>} : memref<2x6xf32, #tpu.memory_space<vmem>>, vector<2x6xf32>,
    return
  }
}

</mosaic_0001>

<bundles_post_ra>
// kernel: ocean_lstm_forward.1
= control target key start
LH: loop header
LB: loop body
LE: loop exit
PB: predicated region body
PF: predicated region fallthrough
CT: control target
= control target key end

     0   :  { %vm78_vm0 = vcmask 1040384   ;;  %v1178_v5 = vmov 0   ;;  %s1446_s0 = inlined_call_operand.vmem [shape: bf16[16,34], index: 0, kind: input, shape index: {}]   ;;  %s1447_s1 = inlined_call_operand.vmem [shape: bf16[34,256], index: 1, kind: input, shape index: {}]   ;;  %s1448_s2 = inlined_call_operand.vmem [shape: f32[1,256], index: 2, kind: input, shape index: {}]   ;;  %s1449_s3 = inlined_call_operand.vmem [shape: bf16[64,256], index: 3, kind: input, shape index: {}]   ;;  %s1450_s4 = inlined_call_operand.vmem [shape: f32[64,6], index: 4, kind: input, shape index: {}]   ;;  %s1451_s5 = inlined_call_operand.vmem [shape: f32[1,6], index: 5, kind: input, shape index: {}]   ;;  %s1452_s6 = inlined_call_operand.hbm [shape: f32[2,6], index: 6, kind: output, shape index: {}]  }
   0x1   :  { %v31_v0 = vld [vmem:[%s1447_s1 + $0x20] sm:$0x11]  ;;  %v1224_v2 = vld [vmem:[%s1449_s3 + $0x34] ss:$8 sps:$4 sm:$0xff]   ;;  %v1229_v4 = vld [vmem:[%s1449_s3 + $0x30] ss:$8 sps:$4 sm:$0xff]   ;;  %117 = vmatprep.mubr.bf16.mxu0 %v1178_v5  ;;  %212 = vmatprep.mubr.bf16.mxu1 %v1178_v5 }
   0x2   :  { %v970_v1 = vcombine.high %v31_v0, %v31_v0  ;;  %v969_v3 = vcombine.low %v31_v0, %v31_v0  ;;  %v1044_v6 = vld [vmem:[%s1447_s1 + $0x14] ss:$8 sps:$4 sm:$0xff]   ;;  %188 = vmatprep.subr.bf16.mxu1 %v1224_v2  ;;  %v1240_v8 = vld [vmem:[%s1449_s3 + $0x24] ss:$8 sps:$4 sm:$0xff]   ;;  %v1048_v9 = vld [vmem:[%s1447_s1 + $0x10] ss:$8 sps:$4 sm:$0xff]  }
   0x3   :  { %189 = vmatpush1.bf16.msra.mxu1 %v1229_v4  ;;  %v1249_v10 = vld [vmem:[%s1449_s3 + $0x20] ss:$8 sps:$4 sm:$0xff]   ;;  %v1050_v11 = vld [vmem:[%s1447_s1 + $0x4] ss:$8 sps:$4 sm:$0xff]   ;;  %v1258_v12 = vld [vmem:[%s1449_s3 + $0x14] ss:$8 sps:$4 sm:$0xff]  }
   0x4   :  { %971 = vmatprep.subr.msk.bf16.mxu0 %vm78_vm0, %v970_v1  ;;  %v80_v7 = vsel %vm78_vm0, %v969_v3, 0  ;;  %190 = vmatprep.subr.bf16.mxu1 %v1240_v8  ;;  %v1054_v13 = vld [vmem:[%s1447_s1] ss:$8 sps:$4 sm:$0xff]   ;;  %v1267_v14 = vld [vmem:[%s1449_s3 + $0x10] ss:$8 sps:$4 sm:$0xff]  }
   0x5   :  { %96 = vmatpush1.bf16.msra.mxu0 %v80_v7  ;;  %v1273_v15 = vld [vmem:[%s1449_s3 + $0x4] ss:$8 sps:$4 sm:$0xff]  }
   0x6   :  { %97 = vmatprep.subr.bf16.mxu0 %v1044_v6 }
   0x7   :  { %191 = vmatpush1.bf16.msra.mxu1 %v1249_v10 }
   0x8   :  { %192 = vmatprep.subr.bf16.mxu1 %v1258_v12 }
   0x9   :  { %98 = vmatpush1.bf16.msra.mxu0 %v1048_v9 }
   0xa   :  { %99 = vmatprep.subr.bf16.mxu0 %v1050_v11 }
   0xb   :  { %11 = vsyncpa [#allocation3], 0  ;;  %v1056_v16 = vld [vmem:[%s1446_s0] sm:$0xff]   ;;  %193 = vmatpush1.bf16.msra.mxu1 %v1267_v14  ;;  %vm74_vm1 = vcmask 277504   ;;  %v34_v18 = vlaneseq  ;;  %vm176_vm2 = vcmask 523264   ;;  %vm1181_vm3 = vmmov 0  }
   0xc   :  { %v1282_v17 = vld [vmem:[%s1449_s3] ss:$8 sps:$4 sm:$0xff]   ;;  %194 = vmatprep.subr.bf16.mxu1 %v1273_v15  ;;  %vm948_vm4 = vcmask 41984  }
   0xd   :  { %100 = vmatpush1.bf16.msra.mxu0 %v1054_v13  ;;  %v35_v19 = vshrl.u32 %v34_v18, 7  ;;  %v32_v21 = vld [vmem:[%s1448_s2] sm:$0x3]  ;;  %s1179_s2 = smov 64  }
   0xe   :  { %265 = vmatprep.subr.bf16.mxu0 %v1224_v2 }
   0xf   :  { %195 = vmatpush1.bf16.msra.mxu1 %v1282_v17  ;;  %v40_v20 = vsub.s32 1, %v35_v19  ;;  %v36_v22 = vsub.s32 0, %v35_v19 }
  0x10   :  { %972 = vmatmul.mubr.msk.bf16.vlgmr.msra.gmra.mxu0 %vm74_vm1, %v1056_v16  ;;  %353 = vmatprep.subr.bf16.mxu1 %v1224_v2 }
  0x11   :  { %266 = vmatpush1.bf16.msra.mxu0 %v1229_v4  ;;  %289 = vmatprep.mubr.bf16.mxu0 %v1178_v5  ;;  %v1310_v23 = vrot.slane %v32_v21, %v40_v20  ;;  %v37_v26 = vrot.slane %v32_v21, %v36_v22 }
  0x12   :  { %267 = vmatprep.subr.bf16.mxu0 %v1240_v8  ;;  %213 = vmatmul.mubr.bf16.vlgmr.msra.gmra.mxu1 %v1178_v5 }
  0x13   :  { %354 = vmatpush1.bf16.msra.mxu1 %v1229_v4  ;;  %377 = vmatprep.mubr.bf16.mxu1 %v1178_v5 }
  0x14   :  { %355 = vmatprep.subr.bf16.mxu1 %v1240_v8 }
  0x15   :  { %268 = vmatpush1.bf16.msra.mxu0 %v1249_v10 }
  0x16   :  { %269 = vmatprep.subr.bf16.mxu0 %v1258_v12 }
  0x17   :  { %356 = vmatpush1.bf16.msra.mxu1 %v1249_v10 }
  0x18   :  { %357 = vmatprep.subr.bf16.mxu1 %v1258_v12 }
  0x19   :  { %270 = vmatpush1.bf16.msra.mxu0 %v1267_v14 }
  0x1a   :  { %271 = vmatprep.subr.bf16.mxu0 %v1273_v15 }
  0x1b   :  { %358 = vmatpush1.bf16.msra.mxu1 %v1267_v14 }
  0x1c   :  { %359 = vmatprep.subr.bf16.mxu1 %v1273_v15 }
  0x1d   :  { %272 = vmatpush1.bf16.msra.mxu0 %v1282_v17 }
  0x1e   :  { %441 = vmatprep.subr.bf16.mxu0 %v1224_v2 }
  0x1f   :  { %360 = vmatpush1.bf16.msra.mxu1 %v1282_v17 }
  0x20   :  { %529 = vmatprep.subr.bf16.mxu1 %v1224_v2 }
  0xd0   :  { %v119_v24 = vpop.f32.mrf.mxu0 }
  0xd1   :  { %v1319_v36 = vadd.f32 %v119_v24, %v37_v26 }
  0xd2   :  { %v121_v25 = vpop.f32.mrf.mxu0  ;;  %v214_v29 = vpop.f32.mrf.mxu1 }
  0xd3   :  { %v1313_v27 = vadd.f32 %v121_v25, %v1310_v23  ;;  %v221_v37 = vadd.f32 %v214_v29, %v1319_v36 }
  0xd4   :  { %v123_v28 = vpop.f32.mrf.mxu0  ;;  %v216_v31 = vpop.f32.mrf.mxu1 }
  0xd5   :  { %v1315_v30 = vadd.f32 %v123_v28, %v37_v26  ;;  %v222_v32 = vadd.f32 %v216_v31, %v1313_v27  ;;  %v981_v38 = vmul.f32 -1.442695, %v221_v37 }
  0xd6   :  { %v218_v33 = vpop.f32.mrf.mxu1  ;;  %v1334_v55 = vpop.f32.mrf.mxu0 }
  0xd7   :  { %1060 = vtanh.f32 %v222_v32  ;;  %v982_v48 = vmul.f32 -1.442695, %v222_v32 }
  0xd8   :  { %v219_v34 = vpop.f32.mrf.mxu1  ;;  %1062 = vpow2.f32 %v981_v38 }
  0xe4   :  { %v1061_v35 = vpop.eup %1060 }
  0xe5   :  { %238 = vrot.lane.b32.xlu0 %v1061_v35, %s1179_s2  ;;  %v1063_v39 = vpop.eup %1062 }
  0xe6   :  { %v229_v40 = vadd.f32 1.0, %v1063_v39 }
  0xe8   :  { %1064 = vrcp.f32 %v229_v40 }
  0xf5   :  { %v1065_v41 = vpop.eup %1064 }
  0xf6   :  { %v236_v44 = vmul.f32 0.0, %v1065_v41 }
 0x157   :  { %v239_v42 = vpop.permute.xlu0 %238 }
 0x158   :  { %v241_v43 = vmul.f32 %v1065_v41, %v239_v42 }
 0x15a   :  { %243 = vrot.lane.b32.xlu0 %v241_v43, %s1179_s2 }
 0x1cc   :  { %v244_v45 = vpop.permute.xlu0 %243 }
 0x1cd   :  { %v246_v46 = vadd.f32 %v244_v45, %v236_v44 }
 0x1cf   :  { %1066 = vtanh.f32 %v246_v46  ;;  %v320_v13 = vrot.slane %v246_v46, 6 }
 0x1d0   :  { %1068 = vpow2.f32 %v982_v48 }
 0x1dc   :  { %v1067_v47 = vpop.eup %1066 }
 0x1dd   :  { %249 = vrot.lane.b32.xlu1 %v1067_v47, %s1179_s2  ;;  %v1069_v49 = vpop.eup %1068 }
 0x1de   :  { %v230_v50 = vadd.f32 1.0, %v1069_v49 }
 0x1e0   :  { %1070 = vrcp.f32 %v230_v50 }
 0x1ed   :  { %v1071_v51 = vpop.eup %1070 }
 0x24f   :  { %v250_v52 = vpop.permute.xlu1 %249 }
 0x250   :  { %v252_v53 = vmul.f32 %v1071_v51, %v250_v52 }
 0x252   :  { %v253_v54 = vpack.c.bf16 %v252_v53, %v252_v53 }
 0x254   :  { %983 = vmatmul.mubr.msk.bf16.vlgmr.msra.gmra.mxu0 %vm176_vm2, %v253_v54 }
 0x255   :  { %442 = vmatpush1.bf16.msra.mxu0 %v1229_v4  ;;  %465 = vmatprep.mubr.bf16.mxu0 %v1178_v5 }
 0x256   :  { %443 = vmatprep.subr.bf16.mxu0 %v1240_v8 }
 0x259   :  { %444 = vmatpush1.bf16.msra.mxu0 %v1249_v10 }
 0x25a   :  { %445 = vmatprep.subr.bf16.mxu0 %v1258_v12 }
 0x25d   :  { %446 = vmatpush1.bf16.msra.mxu0 %v1267_v14 }
 0x25e   :  { %447 = vmatprep.subr.bf16.mxu0 %v1273_v15 }
 0x261   :  { %448 = vmatpush1.bf16.msra.mxu0 %v1282_v17 }
 0x262   :  { %609 = vmatprep.subr.bf16.mxu0 %v1224_v2 }
 0x314   :  { %v291_v56 = vpop.f32.mrf.mxu0 }
 0x315   :  { %v300_v63 = vrot.slane %v291_v56, 6 }
 0x316   :  { %v293_v57 = vpop.f32.mrf.mxu0 }
 0x317   :  { %v301_v58 = vrot.slane %v293_v57, 6  ;;  %v304_v0 = vadd.f32 %v300_v63, %v1319_v36 }
 0x318   :  { %v295_v59 = vpop.f32.mrf.mxu0 }
 0x319   :  { %v305_v60 = vadd.f32 %v301_v58, %v1313_v27  ;;  %v984_v1 = vmul.f32 -1.442695, %v304_v0 }
 0x31a   :  { %v296_v61 = vpop.f32.mrf.mxu0 }
 0x31b   :  { %1072 = vtanh.f32 %v305_v60  ;;  %v985_v21 = vmul.f32 -1.442695, %v305_v60 }
 0x31c   :  { %1074 = vpow2.f32 %v984_v1 }
 0x328   :  { %v1073_v62 = vpop.eup %1072 }
 0x329   :  { %324 = vrot.lane.b32.xlu1 %v1073_v62, %s1179_s2  ;;  %v1075_v3 = vpop.eup %1074 }
 0x32a   :  { %v312_v6 = vadd.f32 1.0, %v1075_v3 }
 0x32c   :  { %1076 = vrcp.f32 %v312_v6 }
 0x339   :  { %v1077_v7 = vpop.eup %1076 }
 0x33a   :  { %v322_v16 = vmul.f32 %v1077_v7, %v320_v13 }
 0x39b   :  { %v325_v9 = vpop.permute.xlu1 %324 }
 0x39c   :  { %v327_v11 = vmul.f32 %v1077_v7, %v325_v9 }
 0x39e   :  { %329 = vrot.lane.b32.xlu0 %v327_v11, %s1179_s2 }
 0x410   :  { %v330_v18 = vpop.permute.xlu0 %329 }
 0x411   :  { %v332_v19 = vadd.f32 %v330_v18, %v322_v16 }
 0x413   :  { %1078 = vtanh.f32 %v332_v19  ;;  %v408_v48 = vrot.slane %v332_v19, 6 }
 0x414   :  { %1080 = vpow2.f32 %v985_v21 }
 0x420   :  { %v1079_v20 = vpop.eup %1078 }
 0x421   :  { %335 = vrot.lane.b32.xlu1 %v1079_v20, %s1179_s2  ;;  %v1081_v22 = vpop.eup %1080 }
 0x422   :  { %v313_v24 = vadd.f32 1.0, %v1081_v22 }
 0x424   :  { %1082 = vrcp.f32 %v313_v24 }
 0x431   :  { %v1083_v25 = vpop.eup %1082 }
 0x493   :  { %v336_v26 = vpop.permute.xlu1 %335 }
 0x494   :  { %v338_v28 = vmul.f32 %v1083_v25, %v336_v26 }
 0x496   :  { %v339_v29 = vpack.c.bf16 %v338_v28, %v338_v28 }
 0x498   :  { %v341_v31 = vrot.slane %v339_v29, 1 }
 0x49a   :  { %986 = vmatmul.mubr.msk.bf16.vlgmr.msra.gmra.mxu1 %vm176_vm2, %v341_v31 }
 0x49b   :  { %530 = vmatpush1.bf16.msra.mxu1 %v1229_v4  ;;  %553 = vmatprep.mubr.bf16.mxu1 %v1178_v5 }
 0x49c   :  { %531 = vmatprep.subr.bf16.mxu1 %v1240_v8 }
 0x49f   :  { %532 = vmatpush1.bf16.msra.mxu1 %v1249_v10 }
 0x4a0   :  { %533 = vmatprep.subr.bf16.mxu1 %v1258_v12 }
 0x4a3   :  { %534 = vmatpush1.bf16.msra.mxu1 %v1267_v14 }
 0x4a4   :  { %535 = vmatprep.subr.bf16.mxu1 %v1273_v15 }
 0x4a7   :  { %536 = vmatpush1.bf16.msra.mxu1 %v1282_v17 }
 0x4a8   :  { %697 = vmatprep.subr.bf16.mxu1 %v1224_v2 }
 0x55a   :  { %v379_v32 = vpop.f32.mrf.mxu1 }
 0x55b   :  { %v388_v40 = vrot.slane %v379_v32, 4 }
 0x55c   :  { %v381_v33 = vpop.f32.mrf.mxu1 }
 0x55d   :  { %v389_v34 = vrot.slane %v381_v33, 4  ;;  %v392_v41 = vadd.f32 %v388_v40, %v1319_v36 }
 0x55e   :  { %v383_v35 = vpop.f32.mrf.mxu1 }
 0x55f   :  { %v393_v37 = vadd.f32 %v389_v34, %v1313_v27  ;;  %v987_v42 = vmul.f32 -1.442695, %v392_v41 }
 0x560   :  { %v384_v38 = vpop.f32.mrf.mxu1 }
 0x561   :  { %1084 = vtanh.f32 %v393_v37  ;;  %v988_v53 = vmul.f32 -1.442695, %v393_v37  ;;  %v1382_v37 = vadd.f32 %v1334_v55, %v1310_v23 }
 0x562   :  { %1086 = vpow2.f32 %v987_v42 }
 0x56e   :  { %v1085_v39 = vpop.eup %1084 }
 0x56f   :  { %412 = vrot.lane.b32.xlu0 %v1085_v39, %s1179_s2  ;;  %v1087_v43 = vpop.eup %1086 }
 0x570   :  { %v400_v44 = vadd.f32 1.0, %v1087_v43 }
 0x572   :  { %1088 = vrcp.f32 %v400_v44 }
 0x57f   :  { %v1089_v45 = vpop.eup %1088 }
 0x580   :  { %v410_v49 = vmul.f32 %v1089_v45, %v408_v48 }
 0x5e1   :  { %v413_v46 = vpop.permute.xlu0 %412 }
 0x5e2   :  { %v415_v47 = vmul.f32 %v1089_v45, %v413_v46 }
 0x5e4   :  { %417 = vrot.lane.b32.xlu1 %v415_v47, %s1179_s2 }
 0x656   :  { %v418_v50 = vpop.permute.xlu1 %417 }
 0x657   :  { %v420_v51 = vadd.f32 %v418_v50, %v410_v49 }
 0x659   :  { %1090 = vtanh.f32 %v420_v51  ;;  %v496_v21 = vrot.slane %v420_v51, 6 }
 0x65a   :  { %1092 = vpow2.f32 %v988_v53 }
 0x666   :  { %v1091_v52 = vpop.eup %1090 }
 0x667   :  { %423 = vrot.lane.b32.xlu0 %v1091_v52, %s1179_s2  ;;  %v1093_v54 = vpop.eup %1092 }
 0x668   :  { %v401_v56 = vadd.f32 1.0, %v1093_v54 }
 0x66a   :  { %1094 = vrcp.f32 %v401_v56 }
 0x677   :  { %v1095_v57 = vpop.eup %1094 }
 0x6d9   :  { %v424_v58 = vpop.permute.xlu0 %423 }
 0x6da   :  { %v426_v59 = vmul.f32 %v1095_v57, %v424_v58 }
 0x6dc   :  { %v427_v60 = vpack.c.bf16 %v426_v59, %v426_v59 }
 0x6de   :  { %v429_v61 = vrot.slane %v427_v60, 2 }
 0x6e0   :  { %989 = vmatmul.mubr.msk.bf16.vlgmr.msra.gmra.mxu0 %vm176_vm2, %v429_v61 }
 0x6e1   :  { %610 = vmatpush1.bf16.msra.mxu0 %v1229_v4  ;;  %633 = vmatprep.mubr.bf16.mxu0 %v1178_v5 }
 0x6e2   :  { %611 = vmatprep.subr.bf16.mxu0 %v1240_v8 }
 0x6e5   :  { %612 = vmatpush1.bf16.msra.mxu0 %v1249_v10 }
 0x6e6   :  { %613 = vmatprep.subr.bf16.mxu0 %v1258_v12 }
 0x6e9   :  { %614 = vmatpush1.bf16.msra.mxu0 %v1267_v14 }
 0x6ea   :  { %615 = vmatprep.subr.bf16.mxu0 %v1273_v15 }
 0x6ed   :  { %616 = vmatpush1.bf16.msra.mxu0 %v1282_v17 }
 0x6ee   :  { %785 = vmatprep.subr.bf16.mxu0 %v1224_v2 }
 0x7a0   :  { %v467_v62 = vpop.f32.mrf.mxu0 }
 0x7a1   :  { %v476_v9 = vrot.slane %v467_v62, 2 }
 0x7a2   :  { %v469_v63 = vpop.f32.mrf.mxu0 }
 0x7a3   :  { %v477_v0 = vrot.slane %v469_v63, 2  ;;  %v480_v11 = vadd.f32 %v476_v9, %v1319_v36 }
 0x7a4   :  { %v471_v1 = vpop.f32.mrf.mxu0 }
 0x7a5   :  { %v481_v3 = vadd.f32 %v477_v0, %v1313_v27  ;;  %v990_v13 = vmul.f32 -1.442695, %v480_v11 }
 0x7a6   :  { %v472_v6 = vpop.f32.mrf.mxu0 }
 0x7a7   :  { %1096 = vtanh.f32 %v481_v3  ;;  %v991_v26 = vmul.f32 -1.442695, %v481_v3 }
 0x7a8   :  { %1098 = vpow2.f32 %v990_v13 }
 0x7b4   :  { %v1097_v7 = vpop.eup %1096 }
 0x7b5   :  { %500 = vrot.lane.b32.xlu1 %v1097_v7, %s1179_s2  ;;  %v1099_v16 = vpop.eup %1098 }
 0x7b6   :  { %v488_v18 = vadd.f32 1.0, %v1099_v16 }
 0x7b8   :  { %1100 = vrcp.f32 %v488_v18 }
 0x7c5   :  { %v1101_v2 = vpop.eup %1100 }
 0x7c6   :  { %v498_v27 = vmul.f32 %v1101_v2, %v496_v21 }
 0x827   :  { %v501_v19 = vpop.permute.xlu1 %500 }
 0x828   :  { %v503_v20 = vmul.f32 %v1101_v2, %v501_v19 }
 0x82a   :  { %505 = vrot.lane.b32.xlu0 %v503_v20, %s1179_s2 }
 0x89c   :  { %v506_v22 = vpop.permute.xlu0 %505 }
 0x89d   :  { %v508_v24 = vadd.f32 %v506_v22, %v498_v27 }
 0x89f   :  { %1102 = vtanh.f32 %v508_v24  ;;  %v578_v55 = vrot.slane %v508_v24, 6 }
 0x8a0   :  { %1104 = vpow2.f32 %v991_v26 }
 0x8ac   :  { %v1103_v25 = vpop.eup %1102 }
 0x8ad   :  { %511 = vrot.lane.b32.xlu1 %v1103_v25, %s1179_s2  ;;  %v1105_v36 = vpop.eup %1104 }
 0x8ae   :  { %v489_v28 = vadd.f32 1.0, %v1105_v36 }
 0x8b0   :  { %1106 = vrcp.f32 %v489_v28 }
 0x8bd   :  { %v1107_v29 = vpop.eup %1106 }
 0x91f   :  { %v512_v31 = vpop.permute.xlu1 %511 }
 0x920   :  { %v514_v32 = vmul.f32 %v1107_v29, %v512_v31 }
 0x922   :  { %v515_v33 = vpack.c.bf16 %v514_v32, %v514_v32 }
 0x924   :  { %v517_v34 = vrot.slane %v515_v33, 3 }
 0x926   :  { %992 = vmatmul.mubr.msk.bf16.vlgmr.msra.gmra.mxu1 %vm176_vm2, %v517_v34 }
 0x927   :  { %698 = vmatpush1.bf16.msra.mxu1 %v1229_v4  ;;  %721 = vmatprep.mubr.bf16.mxu1 %v1178_v5 }
 0x928   :  { %699 = vmatprep.subr.bf16.mxu1 %v1240_v8 }
 0x92b   :  { %700 = vmatpush1.bf16.msra.mxu1 %v1249_v10 }
 0x92c   :  { %701 = vmatprep.subr.bf16.mxu1 %v1258_v12 }
 0x92f   :  { %702 = vmatpush1.bf16.msra.mxu1 %v1267_v14 }
 0x930   :  { %703 = vmatprep.subr.bf16.mxu1 %v1273_v15 }
 0x933   :  { %704 = vmatpush1.bf16.msra.mxu1 %v1282_v17 }
 0x9e6   :  { %v555_v35 = vpop.f32.mrf.mxu1 }
 0x9e7   :  { %v562_v43 = vadd.f32 %v555_v35, %v1315_v30 }
 0x9e8   :  { %v557_v38 = vpop.f32.mrf.mxu1 }
 0x9e9   :  { %v563_v39 = vadd.f32 %v557_v38, %v1382_v37  ;;  %v993_v44 = vmul.f32 -1.442695, %v562_v43 }
 0x9ea   :  { %v559_v40 = vpop.f32.mrf.mxu1 }
 0x9eb   :  { %1108 = vtanh.f32 %v563_v39  ;;  %v994_v53 = vmul.f32 -1.442695, %v563_v39 }
 0x9ec   :  { %v560_v41 = vpop.f32.mrf.mxu1  ;;  %1110 = vpow2.f32 %v993_v44 }
 0x9f8   :  { %v1109_v42 = vpop.eup %1108 }
 0x9f9   :  { %582 = vrot.lane.b32.xlu0 %v1109_v42, %s1179_s2  ;;  %v1111_v45 = vpop.eup %1110 }
 0x9fa   :  { %v570_v46 = vadd.f32 1.0, %v1111_v45 }
 0x9fc   :  { %1112 = vrcp.f32 %v570_v46 }
 0xa09   :  { %v1113_v47 = vpop.eup %1112 }
 0xa0a   :  { %v580_v49 = vmul.f32 %v1113_v47, %v578_v55 }
 0xa6b   :  { %v583_v48 = vpop.permute.xlu0 %582 }
 0xa6c   :  { %v585_v23 = vmul.f32 %v1113_v47, %v583_v48 }
 0xa6e   :  { %587 = vrot.lane.b32.xlu1 %v585_v23, %s1179_s2 }
 0xae0   :  { %v588_v50 = vpop.permute.xlu1 %587 }
 0xae1   :  { %v590_v51 = vadd.f32 %v588_v50, %v580_v49 }
 0xae3   :  { %1114 = vtanh.f32 %v590_v51  ;;  %v664_v7 = vrot.slane %v590_v51, 6 }
 0xae4   :  { %1116 = vpow2.f32 %v994_v53 }
 0xaf0   :  { %v1115_v52 = vpop.eup %1114 }
 0xaf1   :  { %593 = vrot.lane.b32.xlu0 %v1115_v52, %s1179_s2  ;;  %v1117_v54 = vpop.eup %1116 }
 0xaf2   :  { %v571_v56 = vadd.f32 1.0, %v1117_v54 }
 0xaf4   :  { %1118 = vrcp.f32 %v571_v56 }
 0xb01   :  { %v1119_v57 = vpop.eup %1118 }
 0xb63   :  { %v594_v58 = vpop.permute.xlu0 %593 }
 0xb64   :  { %v596_v59 = vmul.f32 %v1119_v57, %v594_v58 }
 0xb66   :  { %v597_v60 = vpack.c.bf16 %v596_v59, %v596_v59 }
 0xb68   :  { %995 = vmatmul.mubr.msk.bf16.vlgmr.msra.gmra.mxu0 %vm176_vm2, %v597_v60 }
 0xb69   :  { %786 = vmatpush1.bf16.msra.mxu0 %v1229_v4  ;;  %809 = vmatprep.mubr.bf16.mxu0 %v1178_v5 }
 0xb6a   :  { %787 = vmatprep.subr.bf16.mxu0 %v1240_v8 }
 0xb6d   :  { %788 = vmatpush1.bf16.msra.mxu0 %v1249_v10 }
 0xb6e   :  { %789 = vmatprep.subr.bf16.mxu0 %v1258_v12 }
 0xb71   :  { %790 = vmatpush1.bf16.msra.mxu0 %v1267_v14 }
 0xb72   :  { %791 = vmatprep.subr.bf16.mxu0 %v1273_v15 }
 0xb75   :  { %792 = vmatpush1.bf16.msra.mxu0 %v1282_v17 }
 0xc28   :  { %v635_v61 = vpop.f32.mrf.mxu0 }
 0xc29   :  { %v644_v8 = vrot.slane %v635_v61, 6 }
 0xc2a   :  { %v637_v62 = vpop.f32.mrf.mxu0 }
 0xc2b   :  { %v645_v63 = vrot.slane %v637_v62, 6  ;;  %v648_v10 = vadd.f32 %v644_v8, %v1315_v30 }
 0xc2c   :  { %v639_v0 = vpop.f32.mrf.mxu0 }
 0xc2d   :  { %v649_v4 = vadd.f32 %v645_v63, %v1382_v37  ;;  %v996_v12 = vmul.f32 -1.442695, %v648_v10 }
 0xc2e   :  { %v640_v1 = vpop.f32.mrf.mxu0 }
 0xc2f   :  { %1120 = vtanh.f32 %v649_v4  ;;  %v997_v18 = vmul.f32 -1.442695, %v649_v4 }
 0xc30   :  { %1122 = vpow2.f32 %v996_v12  ;;  %v1180_v12 = vmov 0.0  }
 0xc31   :  { %1015 = vmatprep.subr.mxu1 %v1180_v12 }
 0xc3c   :  { %v1121_v5 = vpop.eup %1120 }
 0xc3d   :  { %668 = vrot.lane.b32.xlu1 %v1121_v5, %s1179_s2  ;;  %v1123_v14 = vpop.eup %1122 }
 0xc3e   :  { %v656_v15 = vadd.f32 1.0, %v1123_v14  ;;  %v864_v14 = vld [vmem:[%s1450_s4 + $0x28] sm:$0xff] }
 0xc40   :  { %1124 = vrcp.f32 %v656_v15  ;;  %v863_v15 = vld [vmem:[%s1450_s4 + $0x20] sm:$0xff] }
 0xc4d   :  { %v1125_v17 = vpop.eup %1124 }
 0xc4e   :  { %v666_v9 = vmul.f32 %v1125_v17, %v664_v7 }
 0xcaf   :  { %v669_v3 = vpop.permute.xlu1 %668 }
 0xcb0   :  { %v671_v6 = vmul.f32 %v1125_v17, %v669_v3  ;;  %v862_v17 = vld [vmem:[%s1450_s4 + $0x18] sm:$0xff]  ;;  %v861_v3 = vld [vmem:[%s1450_s4 + $0x10] sm:$0xff] }
 0xcb2   :  { %673 = vrot.lane.b32.xlu0 %v671_v6, %s1179_s2 }
 0xd24   :  { %v674_v11 = vpop.permute.xlu0 %673 }
 0xd25   :  { %v676_v13 = vadd.f32 %v674_v11, %v666_v9 }
 0xd27   :  { %1126 = vtanh.f32 %v676_v13  ;;  %v752_v43 = vrot.slane %v676_v13, 6  ;;  %v860_v13 = vld [vmem:[%s1450_s4 + $0x8] sm:$0xff] }
 0xd28   :  { %1128 = vpow2.f32 %v997_v18 }
 0xd34   :  { %v1127_v16 = vpop.eup %1126 }
 0xd35   :  { %679 = vrot.lane.b32.xlu1 %v1127_v16, %s1179_s2  ;;  %v1129_v2 = vpop.eup %1128  ;;  %v859_v16 = vld [vmem:[%s1450_s4] sm:$0xff] }
 0xd36   :  { %v657_v19 = vadd.f32 1.0, %v1129_v2 }
 0xd38   :  { %1130 = vrcp.f32 %v657_v19 }
 0xd45   :  { %v1131_v20 = vpop.eup %1130 }
 0xda7   :  { %v680_v21 = vpop.permute.xlu1 %679 }
 0xda8   :  { %v682_v27 = vmul.f32 %v1131_v20, %v680_v21 }
 0xdaa   :  { %v683_v22 = vpack.c.bf16 %v682_v27, %v682_v27 }
 0xdac   :  { %v685_v24 = vrot.slane %v683_v22, 1 }
 0xdae   :  { %998 = vmatmul.mubr.msk.bf16.vlgmr.msra.gmra.mxu1 %vm176_vm2, %v685_v24 }
 0xdaf   :  { %1031 = vmatprep.mubr.msk.f32.mxu1 %vm1181_vm3, %v1180_v12 }
 0xe6e   :  { %v723_v25 = vpop.f32.mrf.mxu1 }
 0xe6f   :  { %v732_v33 = vrot.slane %v723_v25, 4  ;;  %v1004_v25 = vld [vmem:[%s1451_s5] ss:$0 sm:$0xff] }
 0xe70   :  { %v725_v26 = vpop.f32.mrf.mxu1 }
 0xe71   :  { %v733_v36 = vrot.slane %v725_v26, 4  ;;  %v736_v34 = vadd.f32 %v732_v33, %v1315_v30 }
 0xe72   :  { %v727_v28 = vpop.f32.mrf.mxu1 }
 0xe73   :  { %v737_v29 = vadd.f32 %v733_v36, %v1382_v37  ;;  %v999_v35 = vmul.f32 -1.442695, %v736_v34 }
 0xe74   :  { %v728_v31 = vpop.f32.mrf.mxu1 }
 0xe75   :  { %1132 = vtanh.f32 %v737_v29  ;;  %v1000_v48 = vmul.f32 -1.442695, %v737_v29 }
 0xe76   :  { %1134 = vpow2.f32 %v999_v35 }
 0xe82   :  { %v1133_v32 = vpop.eup %1132 }
 0xe83   :  { %756 = vrot.lane.b32.xlu0 %v1133_v32, %s1179_s2  ;;  %v1135_v38 = vpop.eup %1134 }
 0xe84   :  { %v744_v39 = vadd.f32 1.0, %v1135_v38 }
 0xe86   :  { %1136 = vrcp.f32 %v744_v39 }
 0xe93   :  { %v1137_v40 = vpop.eup %1136 }
 0xe94   :  { %v754_v44 = vmul.f32 %v1137_v40, %v752_v43 }
 0xef5   :  { %v757_v41 = vpop.permute.xlu0 %756 }
 0xef6   :  { %v759_v42 = vmul.f32 %v1137_v40, %v757_v41 }
 0xef8   :  { %761 = vrot.lane.b32.xlu1 %v759_v42, %s1179_s2 }
 0xf6a   :  { %v762_v45 = vpop.permute.xlu1 %761 }
 0xf6b   :  { %v764_v46 = vadd.f32 %v762_v45, %v754_v44 }
 0xf6d   :  { %1138 = vtanh.f32 %v764_v46  ;;  %v840_v6 = vrot.slane %v764_v46, 6 }
 0xf6e   :  { %1140 = vpow2.f32 %v1000_v48 }
 0xf7a   :  { %v1139_v47 = vpop.eup %1138 }
 0xf7b   :  { %767 = vrot.lane.b32.xlu0 %v1139_v47, %s1179_s2  ;;  %v1141_v23 = vpop.eup %1140 }
 0xf7c   :  { %v745_v55 = vadd.f32 1.0, %v1141_v23 }
 0xf7e   :  { %1142 = vrcp.f32 %v745_v55 }
 0xf8b   :  { %v1143_v49 = vpop.eup %1142 }
 0xfed   :  { %v768_v50 = vpop.permute.xlu0 %767 }
 0xfee   :  { %v770_v51 = vmul.f32 %v1143_v49, %v768_v50 }
 0xff0   :  { %v771_v52 = vpack.c.bf16 %v770_v51, %v770_v51 }
 0xff2   :  { %v773_v53 = vrot.slane %v771_v52, 2 }
 0xff4   :  { %1001 = vmatmul.mubr.msk.bf16.vlgmr.msra.gmra.mxu0 %vm176_vm2, %v773_v53 }
0x10b4   :  { %v811_v54 = vpop.f32.mrf.mxu0 }
0x10b5   :  { %v820_v62 = vrot.slane %v811_v54, 2 }
0x10b6   :  { %v813_v56 = vpop.f32.mrf.mxu0 }
0x10b7   :  { %v821_v57 = vrot.slane %v813_v56, 2  ;;  %v824_v63 = vadd.f32 %v820_v62, %v1315_v30  ;;  %v865_v30 = vld [vmem:[%s1450_s4 + $0x30] sm:$0xff] }
0x10b8   :  { %v815_v58 = vpop.f32.mrf.mxu0 }
0x10b9   :  { %v825_v59 = vadd.f32 %v821_v57, %v1382_v37  ;;  %v1002_v0 = vmul.f32 -1.442695, %v824_v63  ;;  %v866_v37 = vld [vmem:[%s1450_s4 + $0x38] sm:$0xff]  ;;  %s1182_s4 = smov [#allocation2]  }
0x10ba   :  { %v816_v60 = vpop.f32.mrf.mxu0  ;;  %1016 = vmatpush3.msra.mxu1 %v866_v37  ;;  %s956_s18 = sshll.u32 %s1182_s4, 4  ;;  %s957_s18 = int_to_ptr.vmem [resolvable:$true] %s956_s18 }
0x10bb   :  { %1144 = vtanh.f32 %v825_v59  ;;  %1017 = vmatprep.subr.mxu1 %v1180_v12  ;;  %v1003_v2 = vmul.f32 -1.442695, %v825_v59  ;;  %s1156_s19 = scalar_lea.vmem %s957_s18, 32  ;;  %p1161_p1 = scmp.lt.s32.totalorder %s957_s18, %s957_s18 }
0x10bc   :  { %1146 = vpow2.f32 %v1002_v0  ;;  %1018 = vmatpush3.msra.mxu1 %v865_v30  ;;  %p1157_p0 = scmp.ne.s32.totalorder %s957_s18, %s1156_s19  ;;  %p1162_p2 = scmp.lt.s32.totalorder %s1156_s19, %s1156_s19 }
0x10bd   :  { %1019 = vmatprep.subr.mxu1 %v1180_v12 }
0x10be   :  { %1020 = vmatpush3.msra.mxu1 %v864_v14  ;;  %p1163_p3 = por %p1162_p2, %p1161_p1 }
0x10bf   :  { %1021 = vmatprep.subr.mxu1 %v1180_v12 }
0x10c0   :  { %1022 = vmatpush3.msra.mxu1 %v863_v15  ;;  %p1164_p4 = pnand %p1163_p3, %p1157_p0 }
0x10c1   :  { %1023 = vmatprep.subr.mxu1 %v1180_v12 }
0x10c2   :  { %1024 = vmatpush3.msra.mxu1 %v862_v17 }
0x10c3   :  { %1025 = vmatprep.subr.mxu1 %v1180_v12 }
0x10c4   :  { %1026 = vmatpush3.msra.mxu1 %v861_v3 }
0x10c5   :  { %1027 = vmatprep.subr.mxu1 %v1180_v12 }
0x10c6   :  { %1028 = vmatpush3.msra.mxu1 %v860_v13 }
0x10c7   :  { %1029 = vmatprep.subr.mxu1 %v1180_v12 }
0x10c8   :  { %v1145_v61 = vpop.eup %1144  ;;  %1030 = vmatpush3.msra.mxu1 %v859_v16 }
0x10c9   :  { %844 = vrot.lane.b32.xlu1 %v1145_v61, %s1179_s2  ;;  %v1147_v4 = vpop.eup %1146 }
0x10ca   :  { %v832_v1 = vadd.f32 1.0, %v1147_v4 }
0x10cc   :  { %1148 = vrcp.f32 %v832_v1 }
0x10d9   :  { %v1149_v5 = vpop.eup %1148 }
0x10da   :  { %v842_v7 = vmul.f32 %v1149_v5, %v840_v6 }
0x113b   :  { %v845_v8 = vpop.permute.xlu1 %844 }
0x113c   :  { %v847_v10 = vmul.f32 %v1149_v5, %v845_v8 }
0x113e   :  { %849 = vrot.lane.b32.xlu0 %v847_v10, %s1179_s2 }
0x11b0   :  { %v850_v9 = vpop.permute.xlu0 %849 }
0x11b1   :  { %v852_v11 = vadd.f32 %v850_v9, %v842_v7 }
0x11b3   :  { %1150 = vtanh.f32 %v852_v11 }
0x11b4   :  { %1152 = vpow2.f32 %v1003_v2 }
0x11c0   :  { %v1151_v18 = vpop.eup %1150 }
0x11c1   :  { %855 = vrot.lane.b32.xlu1 %v1151_v18, %s1179_s2  ;;  %v1153_v19 = vpop.eup %1152 }
0x11c2   :  { %v833_v20 = vadd.f32 1.0, %v1153_v19 }
0x11c4   :  { %1154 = vrcp.f32 %v833_v20 }
0x11d1   :  { %v1155_v21 = vpop.eup %1154 }
0x1233   :  { %v856_v27 = vpop.permute.xlu1 %855 }
0x1234   :  { %v858_v22 = vmul.f32 %v1155_v21, %v856_v27 }
0x1236   :  { %v875_v24 = vrot.slane %v858_v22, 6 }
0x1238   :  { %1032 = vmatmul.mubr.msk.f32.vlgmr.msra.gmra.mxu1 %vm176_vm2, %v875_v24 }
0x12f8   :  { %v944_v26 = vpop.f32.mrf.mxu1 }
0x12f9   :  { %v945_v36 = vadd.f32 %v1004_v25, %v944_v26 }
0x12fa   :  { %v1033_v28 = vpop.f32.mrf.mxu1 }
0x12fb   :  { %949 = vst.msk [vmem:[#allocation2] sm:$0x3] %vm948_vm4, %v945_v36 }
0x12fc   :  { %1167 = shalt.err (!%p1164_p4)
}
0x12fd   :  { %959 = dma.vmem_to_hbm [thread:$0]  %s957_s18, 32, %s1452_s6, [#allocation3]  }
0x12fe   :  { %1176 = dma.done.wait [#allocation3], 32  }
0x12ff   :  { %1177 = vsyncadd [#allocation3], 4294967264 }
0x1300   :  { %963 = vsyncpa [#allocation3], 1 }

</bundles_post_ra>
